<compile_context>
chip_gen: v6e
topology: v6e:2x2x1
jax: 0.10.0
libtpu: 0.0.40
codegen_flags: <defaults>
</compile_context>

<pallas_src>
import functools

import jax
import jax.numpy as jnp
from jax.experimental import pallas as pl
from jax.experimental.pallas import tpu as pltpu


def _round_up(n, m):
    return ((n + m - 1) // m) * m


def _sublane_pack(dtype):
    # rows per packed 32-bit sublane tile: f32 -> 8, bf16 -> 16, int8/fp8 -> 32
    return 8 * (4 // jnp.dtype(dtype).itemsize)


# ----------------------------- kernels -----------------------------

def _linear_kernel_noacc(x_ref, w_ref, b_ref, o_ref):
    # grid = (B tiles, N tiles); K not tiled -> no scratch accumulator, no extra
    # VMEM round-trip (important on v5e's single vst slot).
    o_ref[...] = (
        jnp.dot(x_ref[...], w_ref[...], preferred_element_type=jnp.float32)
        + b_ref[...].astype(jnp.float32)
    ).astype(o_ref.dtype)


def _linear_kernel_acc(x_ref, w_ref, b_ref, o_ref, acc_ref):
    # grid = (B tiles, N tiles, K tiles); reduction axis last.
    k = pl.program_id(2)

    @pl.when(k == 0)
    def _():
        acc_ref[...] = jnp.zeros_like(acc_ref)

    acc_ref[...] += jnp.dot(
        x_ref[...], w_ref[...], preferred_element_type=jnp.float32
    )

    @pl.when(k == pl.num_programs(2) - 1)
    def _():
        o_ref[...] = (acc_ref[...] + b_ref[...].astype(jnp.float32)).astype(o_ref.dtype)


# ------------------------ parameter packing ------------------------

def pack_classifier_params(w, b, *, compute_dtype=None, tn_max=512, tk_max=512):
    """One-time parameter prep (hoisted out of the per-call forward path).

    w: (n_way, dim) in PyTorch nn.Linear layout; b: (n_way,).
    Returns (w_t, b2d):
      w_t: (k_pad, n_pad) pre-transposed, lane-padded, optionally cast (e.g. bf16)
      b2d: (1, n_pad) float32 bias row
    """
    N, K = w.shape
    n_pad = _round_up(N, 128) if N <= tn_max else _round_up(N, tn_max)
    k_pad = K if K <= tk_max else _round_up(K, tk_max)
    w_t = jnp.pad(w, ((0, n_pad - N), (0, k_pad - K))).T  # (k_pad, n_pad)
    if compute_dtype is not None:
        w_t = w_t.astype(compute_dtype)
    b2d = jnp.pad(b, (0, n_pad - N)).astype(jnp.float32).reshape(1, n_pad)
    return w_t, b2d


# ----------------------------- forward ------------------------------

@functools.partial(
    jax.jit, static_argnames=("n_way", "tb_max", "tn_max", "tk_max", "out_dtype")
)
def classifier_forward_packed(
    x, w_t, b2d, *, n_way, tb_max=256, tn_max=512, tk_max=512, out_dtype=None
):
    """y = x @ W^T + b using pre-packed parameters from pack_classifier_params."""
    B, K = x.shape
    k_pad, n_pad = w_t.shape
    out_dtype = x.dtype if out_dtype is None else out_dtype
    compute_dtype = w_t.dtype

    # ---- tiling (shapes are static under jit) ----
    pack = _sublane_pack(compute_dtype)
    if B <= tb_max:
        b_pad = _round_up(B, pack)
        tb = b_pad
    else:
        b_pad = _round_up(B, tb_max)
        tb = tb_max
    # v7x megacore: prefer >=2 B tiles when the batch is large enough to split.
    if b_pad // tb < 2 and b_pad >= 512 and (b_pad // 2) % pack == 0:
        tb = b_pad // 2

    tn = n_pad if n_pad <= tn_max else tn_max   # lane-dense (multiple of 128)
    tk = k_pad if k_pad <= tk_max else tk_max

    n_b_steps = b_pad // tb
    n_n_steps = n_pad // tn
    n_k_steps = k_pad // tk

    # Input padding / cast is per-call (input-dependent); weights are already packed.
    x_p = jnp.pad(x, ((0, b_pad - B), (0, k_pad - K))).astype(compute_dtype)

    in_size = jnp.dtype(compute_dtype).itemsize
    out_size = jnp.dtype(out_dtype).itemsize

    # VMEM budget: double-buffered inputs/outputs + f32 accumulator, with headroom.
    vmem_bytes = (
        2 * tb * tk * in_size          # x tiles
        + 2 * tk * tn * in_size        # W^T tiles
        + 2 * tb * tn * out_size       # output tiles
        + 2 * tn * 4                   # bias row
        + (tb * tn * 4 if n_k_steps > 1 else 0)   # accumulator scratch
    )
    vmem_limit = min(max(int(vmem_bytes * 1.5) + (1 << 20), 16 << 20), 48 << 20)

    cost = pl.CostEstimate(
        flops=2 * b_pad * k_pad * n_pad,
        transcendentals=0,
        bytes_accessed=(
            b_pad * k_pad * in_size * n_n_steps      # x re-streamed per N tile
            + k_pad * n_pad * in_size * n_b_steps    # W re-streamed per B tile
            + n_pad * 4                              # bias
            + b_pad * n_pad * out_size               # output
        ),
    )

    out_shape = jax.ShapeDtypeStruct((b_pad, n_pad), out_dtype)

    if n_k_steps == 1:
        # Fast path: K fits one block -> no accumulator scratch, single-phase store.
        out_pad = pl.pallas_call(
            _linear_kernel_noacc,
            out_shape=out_shape,
            grid_spec=pltpu.PrefetchScalarGridSpec(
                num_scalar_prefetch=0,
                grid=(n_b_steps, n_n_steps),
                in_specs=[
                    pl.BlockSpec((tb, tk), lambda i, j: (i, 0)),   # x tile
                    pl.BlockSpec((tk, tn), lambda i, j: (0, j)),   # W^T tile
                    pl.BlockSpec((1, tn), lambda i, j: (0, j)),    # bias row
                ],
                out_specs=pl.BlockSpec((tb, tn), lambda i, j: (i, j)),
            ),
            compiler_params=pltpu.CompilerParams(
                dimension_semantics=("parallel", "parallel"),
                vmem_limit_bytes=vmem_limit,
            ),
            cost_estimate=cost,
        )(x_p, w_t, b2d)
    else:
        # K-tiled path: f32 VMEM accumulator, init/finalize via pl.when.
        out_pad = pl.pallas_call(
            _linear_kernel_acc,
            out_shape=out_shape,
            grid_spec=pltpu.PrefetchScalarGridSpec(
                num_scalar_prefetch=0,
                grid=(n_b_steps, n_n_steps, n_k_steps),
                in_specs=[
                    pl.BlockSpec((tb, tk), lambda i, j, k: (i, k)),   # x tile
                    pl.BlockSpec((tk, tn), lambda i, j, k: (k, j)),   # W^T tile
                    pl.BlockSpec((1, tn), lambda i, j, k: (0, j)),    # bias row
                ],
                out_specs=pl.BlockSpec((tb, tn), lambda i, j, k: (i, j)),
                scratch_shapes=[pltpu.VMEM((tb, tn), jnp.float32)],
            ),
            compiler_params=pltpu.CompilerParams(
                dimension_semantics=("parallel", "parallel", "arbitrary"),
                vmem_limit_bytes=vmem_limit,
            ),
            cost_estimate=cost,
        )(x_p, w_t, b2d)

    # Slice padding back off.
    return out_pad[:B, :n_way]


def classifier_forward(x, w, b, **kwargs):
    """Convenience one-shot path (packs params per call; prefer packing once)."""
    compute_dtype = kwargs.pop("compute_dtype", None)
    tn_max = kwargs.get("tn_max", 512)
    tk_max = kwargs.get("tk_max", 512)
    w_t, b2d = pack_classifier_params(
        w, b, compute_dtype=compute_dtype, tn_max=tn_max, tk_max=tk_max
    )
    return classifier_forward_packed(x, w_t, b2d, n_way=w.shape[0], **kwargs)


if __name__ == "__main__":
    # Small shapes consistent with the module: feature dim=32, n_way=5, batch=8.
    B, dim, n_way = 8, 32, 5
    key = jax.random.PRNGKey(0)
    kx, kw, kb = jax.random.split(key, 3)

    x = jax.random.normal(kx, (B, dim), dtype=jnp.float32)
    # Deterministic parameter init (mimics nn.Linear uniform(-1/sqrt(dim), 1/sqrt(dim))).
    bound = 1.0 / jnp.sqrt(jnp.float32(dim))
    w = jax.random.uniform(kw, (n_way, dim), dtype=jnp.float32,
                           minval=-bound, maxval=bound)
    b = jax.random.uniform(kb, (n_way,), dtype=jnp.float32,
                           minval=-bound, maxval=bound)
    y_ref = x @ w.T + b

    # --- 1) f32 path, params packed once (fast no-accumulator path) ---
    w_t, b2d = pack_classifier_params(w, b)
    y = classifier_forward_packed(x, w_t, b2d, n_way=n_way)
    jax.block_until_ready(y)
    assert y.shape == (B, n_way)
    assert jnp.allclose(y, y_ref, atol=1e-5, rtol=1e-5), "f32 mismatch vs reference"

    # --- 2) bf16 MXU path (f32 accumulation / epilogue), looser tolerance ---
    w_t16, b2d16 = pack_classifier_params(w, b, compute_dtype=jnp.bfloat16)
    y16 = classifier_forward_packed(x, w_t16, b2d16, n_way=n_way,
                                    out_dtype=jnp.float32)
    jax.block_until_ready(y16)
    assert jnp.allclose(y16, y_ref, atol=3e-2, rtol=3e-2), "bf16 mismatch vs reference"

    # --- 3) exercise the K-tiled accumulator path with small tiles ---
    dim2 = 256
    x2 = jax.random.normal(kx, (B, dim2), dtype=jnp.float32)
    w2 = jax.random.uniform(kw, (n_way, dim2), dtype=jnp.float32,
                            minval=-bound, maxval=bound)
    y2_ref = x2 @ w2.T + b
    w_t2, b2d2 = pack_classifier_params(w2, b, tk_max=128)
    y2 = classifier_forward_packed(x2, w_t2, b2d2, n_way=n_way, tk_max=128)
    jax.block_until_ready(y2)
    assert jnp.allclose(y2, y2_ref, atol=1e-5, rtol=1e-5), "acc-path mismatch"

    print("KERNEL_OK")
</pallas_src>

<mosaic_0001>
module attributes {stable_mosaic.version = 11 : i64} {
  func.func @_linear_kernel_noacc(%arg0: i32, %arg1: i32, %arg2: memref<8x32xf32, #tpu.memory_space<vmem>>, %arg3: memref<32x128xf32, #tpu.memory_space<vmem>>, %arg4: memref<1x128xf32, #tpu.memory_space<vmem>>, %arg5: memref<8x128xf32, #tpu.memory_space<vmem>>) attributes {dimension_semantics = [#tpu.dimension_semantics<parallel>, #tpu.dimension_semantics<parallel>], iteration_bounds = array<i64: 1, 1>, scalar_prefetch = 0 : i64, scratch_operands = 0 : i64, tpu.core_type = #tpu.core_type<tc>, window_params = [{transform_indices = @transform_0, window_bounds = array<i64: 8, 32>}, {transform_indices = @transform_1, window_bounds = array<i64: 32, 128>}, {transform_indices = @transform_2, window_bounds = array<i64: 1, 128>}, {transform_indices = @transform_3, window_bounds = array<i64: 8, 128>}]} {
    %c0 = arith.constant 0 : index
    %c0_0 = arith.constant 0 : index
    %0 = vector.load %arg2[%c0, %c0_0] : memref<8x32xf32, #tpu.memory_space<vmem>>, vector<8x32xf32>
    %c0_1 = arith.constant 0 : index
    %c0_2 = arith.constant 0 : index
    %1 = vector.load %arg3[%c0_1, %c0_2] : memref<32x128xf32, #tpu.memory_space<vmem>>, vector<32x128xf32>
    %cst = arith.constant dense<0.000000e+00> : vector<8x128xf32>
    %2 = tpu.matmul %0, %1, %cst {dimension_numbers = #tpu.dot_dimension_numbers<[1], [0], [0], [1], [0, 0, 1, 1], [], []>} : vector<8x32xf32>, vector<32x128xf32>, vector<8x128xf32> -> vector<8x128xf32>
    %c0_3 = arith.constant 0 : index
    %c0_4 = arith.constant 0 : index
    %3 = vector.load %arg4[%c0_3, %c0_4] : memref<1x128xf32, #tpu.memory_space<vmem>>, vector<1x128xf32>
    %4 = vector.broadcast %3 : vector<1x128xf32> to vector<8x128xf32>
    %5 = arith.addf %2, %4 : vector<8x128xf32>
    %c0_5 = arith.constant 0 : index
    %c0_6 = arith.constant 0 : index
    %6 = vector.load %arg5[%c0_5, %c0_6] : memref<8x128xf32, #tpu.memory_space<vmem>>, vector<8x128xf32>
    tpu.vector_store %arg5[%c0_5, %c0_6], %5 {strides = array<i32>} : memref<8x128xf32, #tpu.memory_space<vmem>>, vector<8x128xf32>,
    return
  }
  func.func @transform_0(%arg0: i32, %arg1: i32) -> (i32, i32) {
    %c0_i32 = arith.constant 0 : i32
    %c0_i32_0 = arith.constant 0 : i32
    return %arg0, %c0_i32 : i32, i32
  }
  func.func @transform_1(%arg0: i32, %arg1: i32) -> (i32, i32) {
    %c0_i32 = arith.constant 0 : i32
    %c0_i32_0 = arith.constant 0 : i32
    return %c0_i32, %arg1 : i32, i32
  }
  func.func @transform_2(%arg0: i32, %arg1: i32) -> (i32, i32) {
    %c0_i32 = arith.constant 0 : i32
    %c0_i32_0 = arith.constant 0 : i32
    return %c0_i32, %arg1 : i32, i32
  }
  func.func @transform_3(%arg0: i32, %arg1: i32) -> (i32, i32) {
    %c0_i32 = arith.constant 0 : i32
    return %arg0, %arg1 : i32, i32
  }
}

</mosaic_0001>

<bundles_post_ra>
// kernel: classifier_forward_packed.1
= control target key start
LH: loop header
LB: loop body
LE: loop exit
PB: predicated region body
PF: predicated region fallthrough
CT: control target
= control target key end

     0   :  { %8 = vsyncpa [#allocation3], 0  ;;  %s274_s0 = inlined_call_operand.hbm [shape: f32[8,32], index: 0, kind: input, shape index: {}]   ;;  %s275_s1 = inlined_call_operand.hbm [shape: f32[32,128], index: 1, kind: input, shape index: {}]   ;;  %s276_s2 = inlined_call_operand.vmem [shape: f32[1,128], index: 2, kind: input, shape index: {}]   ;;  %s277_s3 = inlined_call_operand.hbm [shape: f32[8,128], index: 3, kind: output, shape index: {}]  }
   0x1   :  { %9 = vsyncpa [#allocation6], 0 }
   0x2   :  { %10 = vsyncpa [#allocation4], 0  ;;  %s235_s12 = smov [#allocation2]   ;;  %s236_s14 = smov [#allocation5]  }
   0x3   :  { %s17_s13 = sshll.u32 %s235_s12, 4  ;;  %s26_s15 = sshll.u32 %s236_s14, 4  ;;  %s18_s13 = int_to_ptr.vmem [resolvable:$true] %s17_s13  ;;  %s27_s15 = int_to_ptr.vmem [resolvable:$true] %s26_s15 }
   0x4   :  { %s177_s16 = scalar_lea.vmem %s18_s13, 128  ;;  %p182_p1 = scmp.lt.s32.totalorder %s18_s13, %s18_s13 }
   0x5   :  { %p178_p0 = scmp.ne.s32.totalorder %s18_s13, %s177_s16  ;;  %p183_p2 = scmp.lt.s32.totalorder %s177_s16, %s177_s16 }
   0x7   :  { %p184_p3 = por %p183_p2, %p182_p1 }
   0x9   :  { %p185_p4 = pnand %p184_p3, %p178_p0 }
   0xb   :  { %188 = shalt.err (!%p185_p4)
}
   0xc   :  { %20 = dma.hbm_to_vmem [thread:$0]  %s274_s0, 128, %s18_s13, [#allocation3]  }
   0xd   :  { %s197_s19 = scalar_lea.vmem %s27_s15, 512  ;;  %p202_p6 = scmp.lt.s32.totalorder %s27_s15, %s27_s15 }
   0xe   :  { %p198_p5 = scmp.ne.s32.totalorder %s27_s15, %s197_s19  ;;  %p203_p7 = scmp.lt.s32.totalorder %s197_s19, %s197_s19 }
  0x10   :  { %p204_p8 = por %p203_p7, %p202_p6 }
  0x12   :  { %p205_p9 = pnand %p204_p8, %p198_p5 }
  0x14   :  { %208 = shalt.err (!%p205_p9)
}
  0x15   :  { %s237_s20 = smov 128   ;;  %s238_s21 = smov 8  }
  0x16   :  { %32 = dma.hbm_to_vmem [thread:$0]  %s275_s1, 512, %s27_s15, [#allocation6], %s237_s20, %s237_s20, %s238_s21  }
  0x17   :  { %229 = dma.done.wait [#allocation3], 128  }
  0x18   :  { %230 = vsyncadd [#allocation3], 4294967168 }
  0x19   :  { %231 = dma.done.wait [#allocation6], 512  }
  0x1a   :  { %232 = vsyncadd [#allocation6], 4294966784  ;;  %v239_v0 = vmov 0.0   ;;  %vm240_vm0 = vmmov 0   ;;  %v45_v1 = vld [vmem:[#allocation5 + $0x18] sm:$0xff]  ;;  %v44_v2 = vld [vmem:[#allocation5 + $0x10] sm:$0xff] }
  0x1b   :  { %151 = vmatprep.subr.mxu0 %v239_v0  ;;  %159 = vmatprep.mubr.msk.f32.mxu0 %vm240_vm0, %v239_v0  ;;  %v43_v3 = vld [vmem:[#allocation5 + $0x8] sm:$0xff]  ;;  %v42_v4 = vld [vmem:[#allocation5] sm:$0xff]  ;;  %v41_v5 = vld [vmem:[#allocation2] sm:$0xff]  ;;  %vm53_vm1 = vcmask 261120   ;;  %s241_s24 = smov [#allocation7]  }
  0x1c   :  { %152 = vmatpush3.msra.mxu0 %v45_v1  ;;  %v144_v6 = vld [vmem:[%s276_s2] ss:$0 sm:$0xff]  ;;  %s134_s25 = sshll.u32 %s241_s24, 4  ;;  %s135_s25 = int_to_ptr.vmem [resolvable:$true] %s134_s25 }
  0x1d   :  { %153 = vmatprep.subr.mxu0 %v239_v0  ;;  %s209_s26 = scalar_lea.vmem %s135_s25, 128  ;;  %p214_p11 = scmp.lt.s32.totalorder %s135_s25, %s135_s25 }
  0x1e   :  { %154 = vmatpush3.msra.mxu0 %v44_v2  ;;  %p210_p10 = scmp.ne.s32.totalorder %s135_s25, %s209_s26  ;;  %p215_p12 = scmp.lt.s32.totalorder %s209_s26, %s209_s26 }
  0x1f   :  { %155 = vmatprep.subr.mxu0 %v239_v0 }
  0x20   :  { %156 = vmatpush3.msra.mxu0 %v43_v3  ;;  %p216_p13 = por %p215_p12, %p214_p11 }
  0x21   :  { %157 = vmatprep.subr.mxu0 %v239_v0 }
  0x22   :  { %158 = vmatpush3.msra.mxu0 %v42_v4  ;;  %p217_p0 = pnand %p216_p13, %p210_p10 }
  0x23   :  { %160 = vmatmul.mubr.msk.f32.vlgmr.msra.gmra.mxu0 %vm53_vm1, %v41_v5 }
  0xe3   :  { %v123_v7 = vpop.f32.mrf.mxu0 }
  0xe4   :  { %v124_v8 = vadd.f32 %v144_v6, %v123_v7 }
  0xe5   :  { %v161_v9 = vpop.f32.mrf.mxu0 }
  0xe6   :  { %127 = vst [vmem:[#allocation7] sm:$0xff] %v124_v8 }
  0xe7   :  { %220 = shalt.err (!%p217_p0)
}
  0xe8   :  { %137 = dma.vmem_to_hbm [thread:$0]  %s135_s25, 128, %s277_s3, [#allocation4]  }
  0xe9   :  { %233 = dma.done.wait [#allocation4], 128  }
  0xea   :  { %234 = vsyncadd [#allocation4], 4294967168 }
  0xeb   :  { %141 = vsyncpa [#allocation3], 1 }
  0xec   :  { %142 = vsyncpa [#allocation6], 1 }
  0xed   :  { %143 = vsyncpa [#allocation4], 1 }

</bundles_post_ra>
